<compile_context>
chip_gen: v7x
topology: tpu7x:2x2x1
jax: 0.10.0
libtpu: 0.0.40
codegen_flags: <defaults>
</compile_context>

<pallas_src>
import functools

import jax
import jax.numpy as jnp
from jax.experimental import pallas as pl
from jax.experimental.pallas import tpu as pltpu


# ---------------------------------------------------------------------------
# Generation-aware tiling / VMEM limits.
# ---------------------------------------------------------------------------
def _tpu_vmem_capacity_bytes():
    try:
        info = pltpu.get_tpu_info()
        for attr in ("vmem_capacity_bytes", "vmem_size_bytes", "vmem_bytes"):
            v = getattr(info, attr, None)
            if isinstance(v, int) and v > 0:
                return v
    except Exception:
        pass
    return 64 * 1024 * 1024  # conservative (v7x-sized) fallback


_TPU_VMEM_CAP = _tpu_vmem_capacity_bytes()
if _TPU_VMEM_CAP >= 96 * 1024 * 1024:        # v5e / v6e: 128 MiB physical VMEM
    _VMEM_LIMIT_BYTES = 64 * 1024 * 1024
    _MAX_BATCH_TILE = 4096
else:                                        # v7x (64 MiB) or unknown
    _VMEM_LIMIT_BYTES = 48 * 1024 * 1024
    _MAX_BATCH_TILE = 2048


def _round_up8(x):
    return ((x + 7) // 8) * 8


def _pick_batch_tile(batch, cap=_MAX_BATCH_TILE):
    """Batch tile: as large as the cap allows, but aim for >= 2 tiles (v7x
    megacore) and prefer an exact multiple-of-8 divisor (no masked tail)."""
    if batch <= 8:
        return batch
    tile = min(cap, _round_up8(-(-batch // 2)))   # ceil(batch/2), rounded to 8
    for t in range(tile, 7, -8):
        if batch % t == 0:
            return t
    return tile  # non-divisible: Pallas masks the padded tail block


# ---------------------------------------------------------------------------
# Shared utility kernel (grid over batch tiles).
#   res = x @ R                         (single fused MXU matmul)
#   out[:, :n_h_t] = clamp(truth - clamp(res[:, :n_h_t], 0), 0)   (leftovers)
#   out[:, n_h_t:] = res[:, n_h_t:]     (central util; clamped for misreports)
# ---------------------------------------------------------------------------
def _util_kernel(x_ref, r_ref, truth_ref, out_ref, *, n_h_t, clamp_central):
    res = jnp.dot(x_ref[...], r_ref[...],
                  preferred_element_type=jnp.float32)     # [TB, n_h_t + n_hos]
    allocation = jnp.maximum(res[:, :n_h_t], 0.0)
    out_ref[:, :n_h_t] = jnp.maximum(truth_ref[...] - allocation, 0.0)
    central = res[:, n_h_t:]
    if clamp_central:
        # Intentionally mirrors torch.max(raw * mis_mask, dim=-1): the masked
        # entries are exact zeros, so the max is max(raw_ii, 0).  This differs
        # from calc_util's unclamped central util -- do not "fix".
        central = jnp.maximum(central, 0.0)
    out_ref[:, n_h_t:] = central


def _run_util(x, rhs, truth_flat, *, n_h_t, n_hos, clamp_central):
    """x: [B, K], rhs: [K, n_h_t + n_hos], truth_flat: [B, n_h_t]."""
    B, K = x.shape
    tb = _pick_batch_tile(B)
    n_bt = pl.cdiv(B, tb)
    out = pl.pallas_call(
        functools.partial(_util_kernel, n_h_t=n_h_t, clamp_central=clamp_central),
        out_shape=jax.ShapeDtypeStruct((B, n_h_t + n_hos), jnp.float32),
        grid=(n_bt,),
        in_specs=[pl.BlockSpec((tb, K), lambda bt: (bt, 0)),
                  pl.BlockSpec((K, n_h_t + n_hos), lambda bt: (0, 0)),
                  pl.BlockSpec((tb, n_h_t), lambda bt: (bt, 0))],
        out_specs=pl.BlockSpec((tb, n_h_t + n_hos), lambda bt: (bt, 0)),
        compiler_params=pltpu.CompilerParams(
            dimension_semantics=("parallel",),
            vmem_limit_bytes=_VMEM_LIMIT_BYTES),
    )(x, rhs, truth_flat)
    left_flat = out[:, :n_h_t]
    central = out[:, n_h_t:]
    return central, left_flat


# ---------------------------------------------------------------------------
# create_combined_misreport kernel (grid over batch tiles).
#   out[b, i*n_h_t + (h*n_types + t)] = mis[b, (h,t)] if h == i else true[b,(h,t)]
#   Output is lane-dense (n_hos*n_h_t last dim; 128 lanes for 4x8).
# ---------------------------------------------------------------------------
def _combine_kernel(mis_ref, true_ref, out_ref, *, n_hos, n_types):
    n_h_t = n_hos * n_types
    mis = mis_ref[...]                                    # [TB, n_h_t]
    tru = true_ref[...]
    col = jax.lax.broadcasted_iota(jnp.int32, mis.shape, 1)
    for i in range(n_hos):                                # static unroll; n_hos small
        in_own = (col >= i * n_types) & (col < (i + 1) * n_types)
        out_ref[:, i * n_h_t:(i + 1) * n_h_t] = jnp.where(in_own, mis, tru)


class MatcherPallas:
    """JAX/Pallas port of the Matcher superclass."""

    def __init__(self, n_hos, n_types, central_s, internal_s, weights_matrix,
                 internal_weights):
        self.n_hos = n_hos
        self.n_types = n_types
        self.S = jnp.asarray(central_s, jnp.float32)            # [n_hos*n_types, nS]
        self.int_S = jnp.asarray(internal_s, jnp.float32)       # [n_types, int_structures]
        self.n_structures = self.S.shape[1]
        self.n_h_t_combos = n_hos * n_types
        self.int_structures = self.int_S.shape[1]
        self.weights_matrix = jnp.asarray(weights_matrix, jnp.float32)    # [nS, n_hos]
        self.internal_weights = jnp.asarray(internal_weights, jnp.float32)

        nS, n_h_t = self.n_structures, self.n_h_t_combos

        # Fused RHS for calc_util: one matmul gives allocation and central util.
        #   R_central = [ S^T | W ]  -> [nS, n_h_t + n_hos]
        self.R_central = jnp.concatenate([self.S.T, self.weights_matrix], axis=1)

        # Block-diagonal RHS for calc_mis_util (batch-major mis of width n_hos*nS):
        #   rows i*nS:(i+1)*nS, cols i*n_types:(i+1)*n_types = S_i^T
        #   rows i*nS:(i+1)*nS, col  n_h_t + i              = W[:, i]
        # so one [TB, n_hos*nS] @ [n_hos*nS, n_h_t + n_hos] matmul yields the
        # per-hospital allocations and per-hospital central utils in final
        # column layout (mis_mask / self_mask are realized implicitly).
        S3 = self.S.reshape(n_hos, n_types, nS)
        r_bd = jnp.zeros((n_hos * nS, n_h_t + n_hos), jnp.float32)
        for i in range(n_hos):
            r_bd = r_bd.at[i * nS:(i + 1) * nS,
                           i * n_types:(i + 1) * n_types].set(S3[i].T)
            r_bd = r_bd.at[i * nS:(i + 1) * nS,
                           n_h_t + i].set(self.weights_matrix[:, i])
        self.R_mis_bd = r_bd

    def forward(self, X, batch_size):
        raise NotImplementedError

    # -- internal_linear_prog -------------------------------------------------
    def internal_linear_prog(self, leftovers, n_rows):
        # TODO(synk): internal_linear_prog is abstract in the PyTorch superclass
        # (implemented by Greedy/NN subclasses); return a zero internal allocation.
        return jnp.zeros((n_rows, self.int_structures), jnp.float32)

    # -- calc_util ------------------------------------------------------------
    def calc_util(self, alloc_vec, truthful):
        B = alloc_vec.shape[0]
        n_hos, n_types, n_h_t = self.n_hos, self.n_types, self.n_h_t_combos
        truth_flat = truthful.reshape(B, n_h_t)

        central, left_flat = _run_util(
            alloc_vec, self.R_central, truth_flat,
            n_h_t=n_h_t, n_hos=n_hos, clamp_central=False)

        # NOTE: valid_leftovers() is a host-side debug assertion in PyTorch; skipped.
        leftovers = left_flat.reshape(B * n_hos, n_types)
        internal_alloc = self.internal_linear_prog(leftovers, leftovers.shape[0])
        internal_util = internal_alloc.reshape(B, n_hos, -1) @ self.internal_weights
        return central, internal_util

    # -- calc_mis_util --------------------------------------------------------
    def calc_mis_util(self, mis_alloc, truthful):
        n_hos, n_types = self.n_hos, self.n_types
        n_h_t, nS = self.n_h_t_combos, self.n_structures
        batch = mis_alloc.shape[0] // n_hos

        # Batch-major, lane-folded mis: [B, n_hos*nS] (one-time XLA transpose).
        mis_bm = jnp.transpose(mis_alloc.reshape(n_hos, batch, nS),
                               (1, 0, 2)).reshape(batch, n_hos * nS)
        truth_flat = truthful.reshape(batch, n_h_t)

        central, left_flat = _run_util(
            mis_bm, self.R_mis_bd, truth_flat,
            n_h_t=n_h_t, n_hos=n_hos, clamp_central=True)

        leftovers = left_flat.reshape(batch * n_hos, n_types)  # batch-major, matches torch
        internal_alloc = self.internal_linear_prog(leftovers, leftovers.shape[0])
        internal_util = internal_alloc @ self.internal_weights
        return central + internal_util.reshape(batch, n_hos)

    # -- create_combined_misreport -------------------------------------------
    def create_combined_misreport(self, curr_mis, true_rep):
        B = curr_mis.shape[0]
        n_hos, n_types, n_h_t = self.n_hos, self.n_types, self.n_h_t_combos
        mis_flat = curr_mis.reshape(B, n_h_t)
        true_flat = true_rep.reshape(B, n_h_t)

        tb = _pick_batch_tile(B)
        n_bt = pl.cdiv(B, tb)

        out = pl.pallas_call(
            functools.partial(_combine_kernel, n_hos=n_hos, n_types=n_types),
            out_shape=jax.ShapeDtypeStruct((B, n_hos * n_h_t), jnp.float32),
            grid=(n_bt,),
            in_specs=[pl.BlockSpec((tb, n_h_t), lambda bt: (bt, 0)),
                      pl.BlockSpec((tb, n_h_t), lambda bt: (bt, 0))],
            out_specs=pl.BlockSpec((tb, n_hos * n_h_t), lambda bt: (bt, 0)),
            compiler_params=pltpu.CompilerParams(
                dimension_semantics=("parallel",),
                vmem_limit_bytes=_VMEM_LIMIT_BYTES),
        )(mis_flat, true_flat)
        # Kernel output is lane-dense [B, n_hos*n_h_t]; permute to the
        # PyTorch [n_hos, B, n_hos, n_types] layout in the wrapper (XLA transpose).
        return jnp.transpose(out.reshape(B, n_hos, n_hos, n_types), (1, 0, 2, 3))


# ---------------------------------------------------------------------------
# Plain-JAX references (mirror the PyTorch math) for correctness checking.
# ---------------------------------------------------------------------------
def _ref_calc_util(alloc_vec, truthful, S, W, n_hos, n_types):
    allocation = jnp.clip(alloc_vec @ S.T, 0.0, None).reshape(-1, n_hos, n_types)
    central = alloc_vec @ W
    leftovers = jnp.clip(truthful - allocation, 0.0, None)
    return central, leftovers.reshape(-1, n_types)


def _ref_calc_mis_util(mis_alloc, truthful, S, W, n_hos, n_types):
    batch = mis_alloc.shape[0] // n_hos
    alloc_counts = (mis_alloc.reshape(n_hos, batch, -1) @ S.T
                    ).reshape(n_hos, batch, n_hos, n_types)
    raw = (mis_alloc @ W).reshape(n_hos, batch, n_hos)
    mis_mask = jnp.eye(n_hos)[:, None, :]                       # [n_hos, 1, n_hos]
    central = jnp.max(raw * mis_mask, axis=-1).T                # [B, n_hos]
    lefts = []
    for i in range(n_hos):
        allocated = jnp.clip(alloc_counts[i, :, i, :], 0.0, None)
        lefts.append(jnp.clip(truthful[:, i, :] - allocated, 0.0, None))
    leftovers = jnp.stack(lefts, axis=1).reshape(-1, n_types)
    return central, leftovers


def _ref_combine(curr_mis, true_rep, n_hos):
    self_mask = jnp.zeros((n_hos, 1, n_hos, curr_mis.shape[-1]))
    self_mask = self_mask.at[jnp.arange(n_hos), :, jnp.arange(n_hos), :].set(1.0)
    only_mis = curr_mis[None] * self_mask
    other = true_rep[None] * (1.0 - self_mask)
    return only_mis + other


if __name__ == "__main__":
    n_hos, n_types = 4, 8
    n_structures, int_structures = 16, 8
    B = 8
    n_h_t = n_hos * n_types

    key = jax.random.PRNGKey(0)
    ks = jax.random.split(key, 9)
    # deterministic synthetic parameters
    central_s = (jax.random.uniform(ks[0], (n_h_t, n_structures)) < 0.3
                 ).astype(jnp.float32)
    internal_s = (jax.random.uniform(ks[1], (n_types, int_structures)) < 0.5
                  ).astype(jnp.float32)
    weights_matrix = jax.random.normal(ks[2], (n_structures, n_hos), jnp.float32)
    internal_weights = jax.random.normal(ks[3], (int_structures,), jnp.float32)

    matcher = MatcherPallas(n_hos, n_types, central_s, internal_s,
                            weights_matrix, internal_weights)

    # deterministic synthetic inputs
    alloc_vec = jax.random.uniform(ks[4], (B, n_structures), jnp.float32)
    truthful = jax.random.uniform(ks[5], (B, n_hos, n_types), jnp.float32) * 4.0
    mis_alloc = jax.random.uniform(ks[6], (n_hos * B, n_structures), jnp.float32)
    curr_mis = jax.random.uniform(ks[7], (B, n_hos, n_types), jnp.float32)
    true_rep = jax.random.uniform(ks[8], (B, n_hos, n_types), jnp.float32)

    # --- create_combined_misreport ---
    combined = matcher.create_combined_misreport(curr_mis, true_rep)
    combined = jax.block_until_ready(combined)
    assert combined.shape == (n_hos, B, n_hos, n_types)
    assert jnp.allclose(combined, _ref_combine(curr_mis, true_rep, n_hos),
                        atol=1e-5)

    # --- calc_util ---
    central_util, internal_util = matcher.calc_util(alloc_vec, truthful)
    central_util = jax.block_until_ready(central_util)
    ref_c, _ = _ref_calc_util(alloc_vec, truthful, central_s,
                              weights_matrix, n_hos, n_types)
    assert central_util.shape == (B, n_hos)
    assert internal_util.shape == (B, n_hos)
    assert jnp.allclose(central_util, ref_c, atol=1e-4)

    # --- calc_mis_util ---
    mis_util = matcher.calc_mis_util(mis_alloc, truthful)
    mis_util = jax.block_until_ready(mis_util)
    ref_mis_c, _ = _ref_calc_mis_util(mis_alloc, truthful, central_s,
                                      weights_matrix, n_hos, n_types)
    assert mis_util.shape == (B, n_hos)
    # internal_linear_prog placeholder contributes zero, so mis_util == central part
    assert jnp.allclose(mis_util, ref_mis_c, atol=1e-4)

    print("KERNEL_OK")
</pallas_src>

<mosaic_0001>
module attributes {stable_mosaic.version = 11 : i64} {
  func.func @_combine_kernel(%arg0: i32, %arg1: memref<8x32xf32, #tpu.memory_space<vmem>>, %arg2: memref<8x32xf32, #tpu.memory_space<vmem>>, %arg3: memref<8x128xf32, #tpu.memory_space<vmem>>) attributes {dimension_semantics = [#tpu.dimension_semantics<parallel>], iteration_bounds = array<i64: 1>, scalar_prefetch = 0 : i64, scratch_operands = 0 : i64, tpu.core_type = #tpu.core_type<tc>, window_params = [{transform_indices = @transform_0, window_bounds = array<i64: 8, 32>}, {transform_indices = @transform_1, window_bounds = array<i64: 8, 32>}, {transform_indices = @transform_2, window_bounds = array<i64: 8, 128>}]} {
    %c0 = arith.constant 0 : index
    %c0_0 = arith.constant 0 : index
    %0 = vector.load %arg1[%c0, %c0_0] : memref<8x32xf32, #tpu.memory_space<vmem>>, vector<8x32xf32>
    %c0_1 = arith.constant 0 : index
    %c0_2 = arith.constant 0 : index
    %1 = vector.load %arg2[%c0_1, %c0_2] : memref<8x32xf32, #tpu.memory_space<vmem>>, vector<8x32xf32>
    %2 = tpu.iota {dimensions = array<i32: 1>} : vector<8x32xi32>
    %c0_i32 = arith.constant 0 : i32
    %3 = vector.broadcast %c0_i32 : i32 to vector<8x32xi32>
    %4 = arith.cmpi sge, %2, %3 : vector<8x32xi32>
    %c8_i32 = arith.constant 8 : i32
    %5 = vector.broadcast %c8_i32 : i32 to vector<8x32xi32>
    %6 = arith.cmpi slt, %2, %5 : vector<8x32xi32>
    %7 = arith.andi %4, %6 : vector<8x32xi1>
    %8 = arith.select %7, %0, %1 : vector<8x32xi1>, vector<8x32xf32>
    %c0_3 = arith.constant 0 : index
    %c0_4 = arith.constant 0 : index
    %9 = vector.load %arg3[%c0_3, %c0_4] : memref<8x128xf32, #tpu.memory_space<vmem>>, vector<8x32xf32>
    tpu.vector_store %arg3[%c0_3, %c0_4], %8 {strides = array<i32>} : memref<8x128xf32, #tpu.memory_space<vmem>>, vector<8x32xf32>,
    %c8_i32_5 = arith.constant 8 : i32
    %10 = vector.broadcast %c8_i32_5 : i32 to vector<8x32xi32>
    %11 = arith.cmpi sge, %2, %10 : vector<8x32xi32>
    %c16_i32 = arith.constant 16 : i32
    %12 = vector.broadcast %c16_i32 : i32 to vector<8x32xi32>
    %13 = arith.cmpi slt, %2, %12 : vector<8x32xi32>
    %14 = arith.andi %11, %13 : vector<8x32xi1>
    %15 = arith.select %14, %0, %1 : vector<8x32xi1>, vector<8x32xf32>
    %c0_6 = arith.constant 0 : index
    %c32 = arith.constant 32 : index
    %16 = vector.load %arg3[%c0_6, %c32] : memref<8x128xf32, #tpu.memory_space<vmem>>, vector<8x32xf32>
    tpu.vector_store %arg3[%c0_6, %c32], %15 {strides = array<i32>} : memref<8x128xf32, #tpu.memory_space<vmem>>, vector<8x32xf32>,
    %c16_i32_7 = arith.constant 16 : i32
    %17 = vector.broadcast %c16_i32_7 : i32 to vector<8x32xi32>
    %18 = arith.cmpi sge, %2, %17 : vector<8x32xi32>
    %c24_i32 = arith.constant 24 : i32
    %19 = vector.broadcast %c24_i32 : i32 to vector<8x32xi32>
    %20 = arith.cmpi slt, %2, %19 : vector<8x32xi32>
    %21 = arith.andi %18, %20 : vector<8x32xi1>
    %22 = arith.select %21, %0, %1 : vector<8x32xi1>, vector<8x32xf32>
    %c0_8 = arith.constant 0 : index
    %c64 = arith.constant 64 : index
    %23 = vector.load %arg3[%c0_8, %c64] : memref<8x128xf32, #tpu.memory_space<vmem>>, vector<8x32xf32>
    tpu.vector_store %arg3[%c0_8, %c64], %22 {strides = array<i32>} : memref<8x128xf32, #tpu.memory_space<vmem>>, vector<8x32xf32>,
    %c24_i32_9 = arith.constant 24 : i32
    %24 = vector.broadcast %c24_i32_9 : i32 to vector<8x32xi32>
    %25 = arith.cmpi sge, %2, %24 : vector<8x32xi32>
    %c32_i32 = arith.constant 32 : i32
    %26 = vector.broadcast %c32_i32 : i32 to vector<8x32xi32>
    %27 = arith.cmpi slt, %2, %26 : vector<8x32xi32>
    %28 = arith.andi %25, %27 : vector<8x32xi1>
    %29 = arith.select %28, %0, %1 : vector<8x32xi1>, vector<8x32xf32>
    %c0_10 = arith.constant 0 : index
    %c96 = arith.constant 96 : index
    %30 = vector.load %arg3[%c0_10, %c96] : memref<8x128xf32, #tpu.memory_space<vmem>>, vector<8x32xf32>
    tpu.vector_store %arg3[%c0_10, %c96], %29 {strides = array<i32>} : memref<8x128xf32, #tpu.memory_space<vmem>>, vector<8x32xf32>,
    return
  }
  func.func @transform_0(%arg0: i32) -> (i32, i32) {
    %c0_i32 = arith.constant 0 : i32
    %c0_i32_0 = arith.constant 0 : i32
    return %arg0, %c0_i32 : i32, i32
  }
  func.func @transform_1(%arg0: i32) -> (i32, i32) {
    %c0_i32 = arith.constant 0 : i32
    %c0_i32_0 = arith.constant 0 : i32
    return %arg0, %c0_i32 : i32, i32
  }
  func.func @transform_2(%arg0: i32) -> (i32, i32) {
    %c0_i32 = arith.constant 0 : i32
    %c0_i32_0 = arith.constant 0 : i32
    return %arg0, %c0_i32 : i32, i32
  }
}

</mosaic_0001>

<bundles_post_ra>
// kernel: tpu_custom_call.1
= control target key start
LH: loop header
LB: loop body
LE: loop exit
PB: predicated region body
PF: predicated region fallthrough
CT: control target
= control target key end

     0   :  { %7 = vsyncpa [#allocation3], 0  ;;  %s227_s0 = inlined_call_operand.hbm [shape: f32[8,32], index: 0, kind: input, shape index: {}]   ;;  %s228_s1 = inlined_call_operand.hbm [shape: f32[8,32], index: 1, kind: input, shape index: {}]   ;;  %s229_s2 = inlined_call_operand.hbm [shape: f32[8,128], index: 2, kind: output, shape index: {}]  }
   0x1   :  { %8 = vsyncpa [#allocation6], 0 }
   0x2   :  { %9 = vsyncpa [#allocation4], 0  ;;  %s170_s9 = smov [#allocation2]   ;;  %s171_s11 = smov [#allocation5]  }
   0x3   :  { %s16_s10 = sshll.u32 %s170_s9, 4  ;;  %s26_s12 = sshll.u32 %s171_s11, 4  ;;  %s17_s10 = int_to_ptr.vmem [resolvable:$true] %s16_s10  ;;  %s27_s12 = int_to_ptr.vmem [resolvable:$true] %s26_s12 }
   0x4   :  { %s98_s15 = scalar_lea.hbm %s227_s0, 128 }
   0x5   :  { %p99_p0 = scmp.ne.s32.totalorder %s227_s0, %s98_s15  ;;  %p102_p1 = scmp.lt.u32.totalorder %s98_s15, %s227_s0 }
   0x7   :  { %p104_p2 = pnand %p102_p1, %p99_p0 }
   0x9   :  { %107 = shalt.err (!%p104_p2)
}
   0xa   :  { %s108_s20 = scalar_lea.vmem %s17_s10, 128  ;;  %p113_p4 = scmp.lt.s32.totalorder %s17_s10, %s17_s10 }
   0xb   :  { %p109_p3 = scmp.ne.s32.totalorder %s17_s10, %s108_s20  ;;  %p114_p5 = scmp.lt.s32.totalorder %s108_s20, %s108_s20 }
   0xd   :  { %p115_p6 = por %p114_p5, %p113_p4 }
   0xf   :  { %p116_p7 = pnand %p115_p6, %p109_p3 }
  0x11   :  { %119 = shalt.err (!%p116_p7)
}
  0x12   :  { %19 = dma.hbm_to_vmem [thread:$0]  %s227_s0, 128, %s17_s10, [#allocation3]  }
  0x13   :  { %s120_s25 = scalar_lea.hbm %s228_s1, 128 }
  0x14   :  { %p121_p8 = scmp.ne.s32.totalorder %s228_s1, %s120_s25  ;;  %p124_p9 = scmp.lt.u32.totalorder %s120_s25, %s228_s1 }
  0x16   :  { %p126_p10 = pnand %p124_p9, %p121_p8 }
  0x18   :  { %129 = shalt.err (!%p126_p10)
}
  0x19   :  { %s130_s30 = scalar_lea.vmem %s27_s12, 128  ;;  %p135_p12 = scmp.lt.s32.totalorder %s27_s12, %s27_s12 }
  0x1a   :  { %p131_p11 = scmp.ne.s32.totalorder %s27_s12, %s130_s30  ;;  %p136_p13 = scmp.lt.s32.totalorder %s130_s30, %s130_s30 }
  0x1c   :  { %p137_p0 = por %p136_p13, %p135_p12 }
  0x1e   :  { %p138_p1 = pnand %p137_p0, %p131_p11 }
  0x20   :  { %141 = shalt.err (!%p138_p1)
}
  0x21   :  { %29 = dma.hbm_to_vmem [thread:$0]  %s228_s1, 128, %s27_s12, [#allocation6]  }
  0x22   :  { %164 = dma.done.wait [#allocation3], 128  }
  0x23   :  { %165 = vsyncadd [#allocation3], 4294967168 }
  0x24   :  { %166 = dma.done.wait [#allocation6], 128  }
  0x25   :  { %167 = vsyncadd [#allocation6], 4294967168  ;;  %v38_v0 = vlaneseq  ;;  %vm44_vm9 = vcmask 261120   ;;  %v36_v2 = vld [vmem:[#allocation2] sm:$0xff]  ;;  %v37_v3 = vld [vmem:[#allocation5] sm:$0xff]  ;;  %s172_s1 = smov 32  }
  0x26   :  { %s173_s4 = smov 96   ;;  %s174_s5 = smov 64   ;;  %vm54_vm11 = vcmask 523520   ;;  %vm64_vm12 = vcmask 785920   ;;  %vm74_vm13 = vcmask 1048320  }
  0x27   :  { %v39_v1 = vand.u32 127, %v38_v0  ;;  %s175_s6 = smov [#allocation7]  }
  0x28   :  { %s82_s7 = sshll.u32 %s175_s6, 4  ;;  %s83_s7 = int_to_ptr.vmem [resolvable:$true] %s82_s7 }
  0x29   :  { %vm46_vm0 = vcmp.ge.s32.totalorder %v39_v1, 8  ;;  %vm47_vm1 = vcmp.lt.s32.totalorder %v39_v1, 16  ;;  %vm56_vm2 = vcmp.ge.s32.totalorder %v39_v1, 16  ;;  %vm41_vm3 = vcmp.lt.s32.totalorder %v39_v1, 8  ;;  %s142_s8 = scalar_lea.vmem %s83_s7, 128  ;;  %p147_p3 = scmp.lt.s32.totalorder %s83_s7, %s83_s7 }
  0x2a   :  { %vm48_vm4 = vmand %vm46_vm0, %vm47_vm1  ;;  %vm57_vm5 = vcmp.lt.s32.totalorder %v39_v1, 24  ;;  %vm66_vm6 = vcmp.ge.s32.totalorder %v39_v1, 24  ;;  %vm67_vm7 = vcmp.lt.s32.totalorder %v39_v1, 32  ;;  %v43_v5 = vsel %vm41_vm3, %v36_v2, %v37_v3  ;;  %p143_p2 = scmp.ne.s32.totalorder %s83_s7, %s142_s8  ;;  %p148_p4 = scmp.lt.s32.totalorder %s142_s8, %s142_s8 }
  0x2b   :  { %vm58_vm8 = vmand %vm56_vm2, %vm57_vm5  ;;  %v49_v4 = vsel %vm48_vm4, %v36_v2, %v37_v3  ;;  %45 = vst.msk [vmem:[#allocation7] sm:$0xff] %vm44_vm9, %v43_v5 }
  0x2c   :  { %vm68_vm10 = vmand %vm66_vm6, %vm67_vm7  ;;  %51 = vrot.lane.b32.xlu0 %v49_v4, %s172_s1  ;;  %v59_v7 = vsel %vm58_vm8, %v36_v2, %v37_v3  ;;  %p149_p5 = por %p148_p4, %p147_p3 }
  0x2d   :  { %v69_v6 = vsel %vm68_vm10, %v36_v2, %v37_v3 }
  0x2e   :  { %71 = vrot.lane.b32.xlu1 %v69_v6, %s173_s4  ;;  %p150_p6 = pnand %p149_p5, %p143_p2 }
  0x30   :  { %61 = vrot.lane.b32.xlu0 %v59_v7, %s174_s5 }
  0x9e   :  { %v52_v8 = vpop.permute.xlu0 %51 }
  0x9f   :  { %55 = vst.msk [vmem:[#allocation7] sm:$0xff] %vm54_vm11, %v52_v8 }
  0xa0   :  { %v72_v9 = vpop.permute.xlu1 %71 }
  0xa2   :  { %v62_v10 = vpop.permute.xlu0 %61 }
  0xa3   :  { %65 = vst.msk [vmem:[#allocation7] sm:$0xff] %vm64_vm12, %v62_v10 }
  0xa4   :  { %75 = vst.msk [vmem:[#allocation7] sm:$0xff] %vm74_vm13, %v72_v9 }
  0xa5   :  { %153 = shalt.err (!%p150_p6)
}
  0xa6   :  { %s154_s11 = scalar_lea.hbm %s229_s2, 128 }
  0xa7   :  { %p155_p7 = scmp.ne.s32.totalorder %s229_s2, %s154_s11  ;;  %p158_p8 = scmp.lt.u32.totalorder %s154_s11, %s229_s2 }
  0xa9   :  { %p160_p9 = pnand %p158_p8, %p155_p7 }
  0xab   :  { %163 = shalt.err (!%p160_p9)
}
  0xac   :  { %85 = dma.vmem_to_hbm [thread:$0]  %s83_s7, 128, %s229_s2, [#allocation4]  }
  0xad   :  { %168 = dma.done.wait [#allocation4], 128  }
  0xae   :  { %169 = vsyncadd [#allocation4], 4294967168 }
  0xaf   :  { %89 = vsyncpa [#allocation3], 1 }
  0xb0   :  { %90 = vsyncpa [#allocation6], 1 }
  0xb1   :  { %91 = vsyncpa [#allocation4], 1 }

</bundles_post_ra>
